<compile_context>
chip_gen: v5e
topology: v5e:2x2
jax: 0.10.0
libtpu: 0.0.40
codegen_flags: <defaults>
</compile_context>

<pallas_src>
import functools

import jax
import jax.numpy as jnp
from jax.experimental import pallas as pl
from jax.experimental.pallas import tpu as pltpu

_LANE = 128
_BATCH_GRANULE = 16  # bf16 packs 16 rows per vreg; keep batch tiles 16-row aligned.


def _round_up(x, m):
    return (x + m - 1) // m * m


def _cdiv(a, b):
    return (a + b - 1) // b


def merge_layer_kernel(x1_ref, x2_ref, w1a_ref, w1b_ref, b1_ref, w2_ref, b2_ref,
                       o_ref, *, bf16_act):
    cdt = w1a_ref.dtype
    # fc1 split at the concat boundary: two accumulating MXU dots, no concat temp.
    # x is cast f32 -> bf16 in-register (VPU), hidden under MXU / DMA work.
    h = jnp.dot(x1_ref[...].astype(cdt), w1a_ref[...],
                preferred_element_type=jnp.float32)
    h = h + jnp.dot(x2_ref[...].astype(cdt), w1b_ref[...],
                    preferred_element_type=jnp.float32)
    if bf16_act:
        # v6e / v7x: bf16 VALU -> halves vreg pressure of the (tb, d3p) temp.
        h = jnp.maximum(h.astype(cdt) + b1_ref[...].astype(cdt), 0.0)
    else:
        # v5e and older: no bf16 VPU path -> keep elementwise math in f32.
        h = jnp.maximum(h + b1_ref[...], 0.0).astype(cdt)
    y = jnp.dot(h, w2_ref[...], preferred_element_type=jnp.float32)
    o_ref[...] = (y + b2_ref[...]).astype(o_ref.dtype)


def _device_has_bf16_valu():
    try:
        kind = jax.devices()[0].device_kind.lower()
    except Exception:  # pragma: no cover - defensive only
        return False
    if "tpu" not in kind:
        return False
    # v5e / v5p / v4 and older have no bf16 VPU path.
    return not any(tag in kind for tag in ("v2", "v3", "v4", "v5"))


def prepare_params(w1_t, b1, w2_t, b2, dim1, *, compute_dtype=jnp.bfloat16):
    """One-time host-side layout work (hoisted out of the hot path):
    split fc1's weight at the concat boundary and zero-pad d3 up to a lane
    multiple so both MXU feeds are lane-dense.  d4 (output features) is left
    un-padded so the kernel only writes real columns back to HBM.
    w1_t: [d1+d2, d3], b1: [1, d3], w2_t: [d3, d4], b2: [1, d4]."""
    _, d3 = w1_t.shape
    d3p = _round_up(d3, _LANE)
    w1a = jnp.pad(w1_t[:dim1], ((0, 0), (0, d3p - d3))).astype(compute_dtype)
    w1b = jnp.pad(w1_t[dim1:], ((0, 0), (0, d3p - d3))).astype(compute_dtype)
    b1p = jnp.pad(b1, ((0, 0), (0, d3p - d3))).astype(jnp.float32)
    w2p = jnp.pad(w2_t, ((0, d3p - d3), (0, 0))).astype(compute_dtype)
    b2p = b2.astype(jnp.float32)
    return w1a, w1b, b1p, w2p, b2p


def _pick_batch_tile(B, block_b, d1, d2, d3p, d4, w_nbytes):
    g = _BATCH_GRANULE
    b_ceil = _round_up(B, 8)
    if b_ceil <= g:
        return b_ceil  # tiny batch: one full tile, minimal sublane count
    # Ensure >= 2 grid steps whenever the batch allows (v7x megacore sharding).
    tb = min(_round_up(block_b, g), _round_up(_cdiv(B, 2), g), _round_up(B, g))
    tb = max(tb, g)

    resident = w_nbytes + 4 * (d3p + d4)  # single-buffered weights + biases
    budget = 12 * 1024 * 1024             # safe under v5e's 16 MiB scoped default

    def live(t):
        streams = 2 * t * (d1 + d2) * 4 + 2 * t * d4 * 4  # dbl-buffered f32 x / out
        temps = t * d3p * 4                                # hidden accumulator
        return resident + streams + temps

    while tb > g and live(tb) > budget:
        tb = max(g, _round_up(tb // 2, g))
    return tb


def merge_layer(x1, x2, w1a, w1b, b1, w2, b2, *, block_b=256, bf16_act=None):
    """x1: [B, d1], x2: [B, d2]; padded/split params from prepare_params.
    Returns [B, d4] in x1.dtype (float32 -> matches the PyTorch module)."""
    B, d1 = x1.shape
    d2 = x2.shape[1]
    d3p = w1a.shape[1]
    d4 = w2.shape[1]
    out_dtype = x1.dtype

    if bf16_act is None:
        bf16_act = _device_has_bf16_valu()

    w_nbytes = sum(int(a.size) * a.dtype.itemsize for a in (w1a, w1b, w2))
    tb = _pick_batch_tile(B, block_b, d1, d2, d3p, d4, w_nbytes)
    grid = (_cdiv(B, tb),)

    flops = 2 * B * (d1 + d2) * d3p + 2 * B * d3p * d4
    bytes_accessed = (B * (d1 + d2) * x1.dtype.itemsize        # f32 x reads
                      + w_nbytes + 4 * (d3p + d4)              # weights + biases
                      + B * d4 * out_dtype.itemsize)           # un-padded writeback

    # Per-generation VMEM hygiene: raise the scoped limit only when the live set
    # (resident weights + double-buffered streams + hidden temp) needs it.
    vmem_estimate = (w_nbytes + 4 * (d3p + d4)
                     + 2 * tb * (d1 + d2) * x1.dtype.itemsize
                     + 2 * tb * d4 * out_dtype.itemsize
                     + tb * d3p * 4)
    compiler_kwargs = dict(dimension_semantics=("parallel",))
    if vmem_estimate > 24 * 1024 * 1024:
        compiler_kwargs["vmem_limit_bytes"] = int(
            min(vmem_estimate * 1.25, 128 * 1024 * 1024))

    kernel = functools.partial(merge_layer_kernel, bf16_act=bf16_act)

    def build(single_buffer_weights):
        resident_kw = (dict(pipeline_mode=pl.Buffered(1))
                       if single_buffer_weights else {})
        in_specs = [
            pl.BlockSpec((tb, d1), lambda i: (i, 0)),                   # x1 (pipelined)
            pl.BlockSpec((tb, d2), lambda i: (i, 0)),                   # x2 (pipelined)
            pl.BlockSpec((d1, d3p), lambda i: (0, 0), **resident_kw),   # W1a resident
            pl.BlockSpec((d2, d3p), lambda i: (0, 0), **resident_kw),   # W1b resident
            pl.BlockSpec((1, d3p), lambda i: (0, 0), **resident_kw),    # b1 resident
            pl.BlockSpec((d3p, d4), lambda i: (0, 0), **resident_kw),   # W2 resident
            pl.BlockSpec((1, d4), lambda i: (0, 0), **resident_kw),     # b2 resident
        ]
        return pl.pallas_call(
            kernel,
            out_shape=jax.ShapeDtypeStruct((B, d4), out_dtype),
            grid=grid,
            in_specs=in_specs,
            out_specs=pl.BlockSpec((tb, d4), lambda i: (i, 0)),
            compiler_params=pltpu.CompilerParams(**compiler_kwargs),
            cost_estimate=pl.CostEstimate(
                flops=int(flops), transcendentals=0,
                bytes_accessed=int(bytes_accessed)),
        )

    try:
        return build(True)(x1, x2, w1a, w1b, b1, w2, b2)
    except Exception:
        # Installed JAX rejected single-buffered resident specs -> default buffering.
        return build(False)(x1, x2, w1a, w1b, b1, w2, b2)


def init_params(key, dim1, dim2, dim3, dim4):
    """Deterministic synthetic init mirroring the module's shapes.
    fc1/fc2 weights xavier-normal; biases ~ PyTorch default uniform."""
    k1, k2, k3, k4 = jax.random.split(key, 4)
    fan_in1, fan_out1 = dim1 + dim2, dim3
    fan_in2, fan_out2 = dim3, dim4
    std1 = (2.0 / (fan_in1 + fan_out1)) ** 0.5
    std2 = (2.0 / (fan_in2 + fan_out2)) ** 0.5
    w1 = std1 * jax.random.normal(k1, (dim3, dim1 + dim2), jnp.float32)  # [out, in]
    w2 = std2 * jax.random.normal(k2, (dim4, dim3), jnp.float32)          # [out, in]
    b1 = jax.random.uniform(k3, (1, dim3), jnp.float32,
                            -1.0 / fan_in1 ** 0.5, 1.0 / fan_in1 ** 0.5)
    b2 = jax.random.uniform(k4, (1, dim4), jnp.float32,
                            -1.0 / fan_in2 ** 0.5, 1.0 / fan_in2 ** 0.5)
    # Kernel consumes transposed ([in, out]) weights so it computes x @ W + b.
    return w1.T, b1, w2.T, b2


if __name__ == "__main__":
    B, dim1, dim2, dim3, dim4 = 8, 32, 32, 64, 16

    key = jax.random.PRNGKey(0)
    kx1, kx2, kp = jax.random.split(key, 3)
    x1 = jax.random.normal(kx1, (B, dim1), jnp.float32)
    x2 = jax.random.normal(kx2, (B, dim2), jnp.float32)
    w1_t, b1, w2_t, b2 = init_params(kp, dim1, dim2, dim3, dim4)

    params = prepare_params(w1_t, b1, w2_t, b2, dim1)  # one-time layout work
    out = merge_layer(x1, x2, *params, block_b=256)
    out = jax.block_until_ready(out)

    # Pure-f32 JAX reference of the module's math. The kernel uses bf16 MXU inputs
    # with f32 accumulation, so use a bf16-appropriate tolerance.
    x = jnp.concatenate([x1, x2], axis=1)
    ref = jnp.maximum(x @ w1_t + b1, 0.0) @ w2_t + b2
    assert out.shape == (B, dim4), out.shape
    assert jnp.allclose(out, ref, atol=5e-2, rtol=5e-2), \
        float(jnp.max(jnp.abs(out - ref)))

    print("KERNEL_OK")
</pallas_src>

<mosaic_0001>
module attributes {stable_mosaic.version = 11 : i64} {
  func.func @merge_layer_kernel(%arg0: i32, %arg1: memref<8x32xf32, #tpu.memory_space<vmem>>, %arg2: memref<8x32xf32, #tpu.memory_space<vmem>>, %arg3: memref<32x128xbf16, #tpu.memory_space<vmem>>, %arg4: memref<32x128xbf16, #tpu.memory_space<vmem>>, %arg5: memref<1x128xf32, #tpu.memory_space<vmem>>, %arg6: memref<128x16xbf16, #tpu.memory_space<vmem>>, %arg7: memref<1x16xf32, #tpu.memory_space<vmem>>, %arg8: memref<8x16xf32, #tpu.memory_space<vmem>>) attributes {dimension_semantics = [#tpu.dimension_semantics<parallel>], iteration_bounds = array<i64: 1>, scalar_prefetch = 0 : i64, scratch_operands = 0 : i64, tpu.core_type = #tpu.core_type<tc>, window_params = [{transform_indices = @transform_0, window_bounds = array<i64: 8, 32>}, {transform_indices = @transform_1, window_bounds = array<i64: 8, 32>}, {pipeline_mode = #tpu.pipeline_mode<synchronous>, transform_indices = @transform_2, window_bounds = array<i64: 32, 128>}, {pipeline_mode = #tpu.pipeline_mode<synchronous>, transform_indices = @transform_3, window_bounds = array<i64: 32, 128>}, {pipeline_mode = #tpu.pipeline_mode<synchronous>, transform_indices = @transform_4, window_bounds = array<i64: 1, 128>}, {pipeline_mode = #tpu.pipeline_mode<synchronous>, transform_indices = @transform_5, window_bounds = array<i64: 128, 16>}, {pipeline_mode = #tpu.pipeline_mode<synchronous>, transform_indices = @transform_6, window_bounds = array<i64: 1, 16>}, {transform_indices = @transform_7, window_bounds = array<i64: 8, 16>}]} {
    %c0 = arith.constant 0 : index
    %c0_0 = arith.constant 0 : index
    %0 = vector.load %arg1[%c0, %c0_0] : memref<8x32xf32, #tpu.memory_space<vmem>>, vector<8x32xf32>
    %1 = arith.truncf %0 : vector<8x32xf32> to vector<8x32xbf16>
    %c0_1 = arith.constant 0 : index
    %c0_2 = arith.constant 0 : index
    %2 = vector.load %arg3[%c0_1, %c0_2] : memref<32x128xbf16, #tpu.memory_space<vmem>>, vector<32x128xbf16>
    %cst = arith.constant dense<0.000000e+00> : vector<8x128xf32>
    %3 = tpu.matmul %1, %2, %cst {dimension_numbers = #tpu.dot_dimension_numbers<[1], [0], [0], [1], [0, 0, 1, 1], [], []>} : vector<8x32xbf16>, vector<32x128xbf16>, vector<8x128xf32> -> vector<8x128xf32>
    %c0_3 = arith.constant 0 : index
    %c0_4 = arith.constant 0 : index
    %4 = vector.load %arg2[%c0_3, %c0_4] : memref<8x32xf32, #tpu.memory_space<vmem>>, vector<8x32xf32>
    %5 = arith.truncf %4 : vector<8x32xf32> to vector<8x32xbf16>
    %c0_5 = arith.constant 0 : index
    %c0_6 = arith.constant 0 : index
    %6 = vector.load %arg4[%c0_5, %c0_6] : memref<32x128xbf16, #tpu.memory_space<vmem>>, vector<32x128xbf16>
    %cst_7 = arith.constant dense<0.000000e+00> : vector<8x128xf32>
    %7 = tpu.matmul %5, %6, %cst_7 {dimension_numbers = #tpu.dot_dimension_numbers<[1], [0], [0], [1], [0, 0, 1, 1], [], []>} : vector<8x32xbf16>, vector<32x128xbf16>, vector<8x128xf32> -> vector<8x128xf32>
    %8 = arith.addf %3, %7 : vector<8x128xf32>
    %c0_8 = arith.constant 0 : index
    %c0_9 = arith.constant 0 : index
    %9 = vector.load %arg5[%c0_8, %c0_9] : memref<1x128xf32, #tpu.memory_space<vmem>>, vector<1x128xf32>
    %10 = vector.broadcast %9 : vector<1x128xf32> to vector<8x128xf32>
    %11 = arith.addf %8, %10 : vector<8x128xf32>
    %cst_10 = arith.constant 0.000000e+00 : f32
    %12 = vector.broadcast %cst_10 : f32 to vector<8x128xf32>
    %13 = arith.maximumf %11, %12 : vector<8x128xf32>
    %14 = arith.truncf %13 : vector<8x128xf32> to vector<8x128xbf16>
    %c0_11 = arith.constant 0 : index
    %c0_12 = arith.constant 0 : index
    %15 = vector.load %arg6[%c0_11, %c0_12] : memref<128x16xbf16, #tpu.memory_space<vmem>>, vector<128x16xbf16>
    %cst_13 = arith.constant dense<0.000000e+00> : vector<8x16xf32>
    %16 = tpu.matmul %14, %15, %cst_13 {dimension_numbers = #tpu.dot_dimension_numbers<[1], [0], [0], [1], [0, 0, 1, 1], [], []>} : vector<8x128xbf16>, vector<128x16xbf16>, vector<8x16xf32> -> vector<8x16xf32>
    %c0_14 = arith.constant 0 : index
    %c0_15 = arith.constant 0 : index
    %17 = vector.load %arg7[%c0_14, %c0_15] : memref<1x16xf32, #tpu.memory_space<vmem>>, vector<1x16xf32>
    %18 = vector.broadcast %17 : vector<1x16xf32> to vector<8x16xf32>
    %19 = arith.addf %16, %18 : vector<8x16xf32>
    %c0_16 = arith.constant 0 : index
    %c0_17 = arith.constant 0 : index
    %20 = vector.load %arg8[%c0_16, %c0_17] : memref<8x16xf32, #tpu.memory_space<vmem>>, vector<8x16xf32>
    tpu.vector_store %arg8[%c0_16, %c0_17], %19 {strides = array<i32>} : memref<8x16xf32, #tpu.memory_space<vmem>>, vector<8x16xf32>,
    return
  }
  func.func @transform_0(%arg0: i32) -> (i32, i32) {
    %c0_i32 = arith.constant 0 : i32
    %c0_i32_0 = arith.constant 0 : i32
    return %arg0, %c0_i32 : i32, i32
  }
  func.func @transform_1(%arg0: i32) -> (i32, i32) {
    %c0_i32 = arith.constant 0 : i32
    %c0_i32_0 = arith.constant 0 : i32
    return %arg0, %c0_i32 : i32, i32
  }
  func.func @transform_2(%arg0: i32) -> (i32, i32) {
    %c0_i32 = arith.constant 0 : i32
    %c0_i32_0 = arith.constant 0 : i32
    %c0_i32_1 = arith.constant 0 : i32
    return %c0_i32, %c0_i32_0 : i32, i32
  }
  func.func @transform_3(%arg0: i32) -> (i32, i32) {
    %c0_i32 = arith.constant 0 : i32
    %c0_i32_0 = arith.constant 0 : i32
    %c0_i32_1 = arith.constant 0 : i32
    return %c0_i32, %c0_i32_0 : i32, i32
  }
  func.func @transform_4(%arg0: i32) -> (i32, i32) {
    %c0_i32 = arith.constant 0 : i32
    %c0_i32_0 = arith.constant 0 : i32
    %c0_i32_1 = arith.constant 0 : i32
    return %c0_i32, %c0_i32_0 : i32, i32
  }
  func.func @transform_5(%arg0: i32) -> (i32, i32) {
    %c0_i32 = arith.constant 0 : i32
    %c0_i32_0 = arith.constant 0 : i32
    %c0_i32_1 = arith.constant 0 : i32
    return %c0_i32, %c0_i32_0 : i32, i32
  }
  func.func @transform_6(%arg0: i32) -> (i32, i32) {
    %c0_i32 = arith.constant 0 : i32
    %c0_i32_0 = arith.constant 0 : i32
    %c0_i32_1 = arith.constant 0 : i32
    return %c0_i32, %c0_i32_0 : i32, i32
  }
  func.func @transform_7(%arg0: i32) -> (i32, i32) {
    %c0_i32 = arith.constant 0 : i32
    %c0_i32_0 = arith.constant 0 : i32
    return %arg0, %c0_i32 : i32, i32
  }
}

module attributes {stable_mosaic.version = 11 : i64} {
  func.func @merge_layer_kernel(%arg0: i32, %arg1: memref<8x32xf32, #tpu.memory_space<vmem>>, %arg2: memref<8x32xf32, #tpu.memory_space<vmem>>, %arg3: memref<32x128xbf16, #tpu.memory_space<vmem>>, %arg4: memref<32x128xbf16, #tpu.memory_space<vmem>>, %arg5: memref<1x128xf32, #tpu.memory_space<vmem>>, %arg6: memref<128x16xbf16, #tpu.memory_space<vmem>>, %arg7: memref<1x16xf32, #tpu.memory_space<vmem>>, %arg8: memref<8x16xf32, #tpu.memory_space<vmem>>) attributes {dimension_semantics = [#tpu.dimension_semantics<parallel>], iteration_bounds = array<i64: 1>, scalar_prefetch = 0 : i64, scratch_operands = 0 : i64, tpu.core_type = #tpu.core_type<tc>, window_params = [{transform_indices = @transform_0, window_bounds = array<i64: 8, 32>}, {transform_indices = @transform_1, window_bounds = array<i64: 8, 32>}, {pipeline_mode = #tpu.pipeline_mode<synchronous>, transform_indices = @transform_2, window_bounds = array<i64: 32, 128>}, {pipeline_mode = #tpu.pipeline_mode<synchronous>, transform_indices = @transform_3, window_bounds = array<i64: 32, 128>}, {pipeline_mode = #tpu.pipeline_mode<synchronous>, transform_indices = @transform_4, window_bounds = array<i64: 1, 128>}, {pipeline_mode = #tpu.pipeline_mode<synchronous>, transform_indices = @transform_5, window_bounds = array<i64: 128, 16>}, {pipeline_mode = #tpu.pipeline_mode<synchronous>, transform_indices = @transform_6, window_bounds = array<i64: 1, 16>}, {transform_indices = @transform_7, window_bounds = array<i64: 8, 16>}]} {
    %c0 = arith.constant 0 : index
    %c0_0 = arith.constant 0 : index
    %0 = vector.load %arg1[%c0, %c0_0] : memref<8x32xf32, #tpu.memory_space<vmem>>, vector<8x32xf32>
    %1 = arith.truncf %0 : vector<8x32xf32> to vector<8x32xbf16>
    %c0_1 = arith.constant 0 : index
    %c0_2 = arith.constant 0 : index
    %2 = vector.load %arg3[%c0_1, %c0_2] : memref<32x128xbf16, #tpu.memory_space<vmem>>, vector<32x128xbf16>
    %cst = arith.constant dense<0.000000e+00> : vector<8x128xf32>
    %3 = tpu.matmul %1, %2, %cst {dimension_numbers = #tpu.dot_dimension_numbers<[1], [0], [0], [1], [0, 0, 1, 1], [], []>} : vector<8x32xbf16>, vector<32x128xbf16>, vector<8x128xf32> -> vector<8x128xf32>
    %c0_3 = arith.constant 0 : index
    %c0_4 = arith.constant 0 : index
    %4 = vector.load %arg2[%c0_3, %c0_4] : memref<8x32xf32, #tpu.memory_space<vmem>>, vector<8x32xf32>
    %5 = arith.truncf %4 : vector<8x32xf32> to vector<8x32xbf16>
    %c0_5 = arith.constant 0 : index
    %c0_6 = arith.constant 0 : index
    %6 = vector.load %arg4[%c0_5, %c0_6] : memref<32x128xbf16, #tpu.memory_space<vmem>>, vector<32x128xbf16>
    %cst_7 = arith.constant dense<0.000000e+00> : vector<8x128xf32>
    %7 = tpu.matmul %5, %6, %cst_7 {dimension_numbers = #tpu.dot_dimension_numbers<[1], [0], [0], [1], [0, 0, 1, 1], [], []>} : vector<8x32xbf16>, vector<32x128xbf16>, vector<8x128xf32> -> vector<8x128xf32>
    %8 = arith.addf %3, %7 : vector<8x128xf32>
    %c0_8 = arith.constant 0 : index
    %c0_9 = arith.constant 0 : index
    %9 = vector.load %arg5[%c0_8, %c0_9] : memref<1x128xf32, #tpu.memory_space<vmem>>, vector<1x128xf32>
    %10 = vector.broadcast %9 : vector<1x128xf32> to vector<8x128xf32>
    %11 = arith.addf %8, %10 : vector<8x128xf32>
    %cst_10 = arith.constant 0.000000e+00 : f32
    %12 = vector.broadcast %cst_10 : f32 to vector<8x128xf32>
    %13 = arith.maximumf %11, %12 : vector<8x128xf32>
    %14 = arith.truncf %13 : vector<8x128xf32> to vector<8x128xbf16>
    %c0_11 = arith.constant 0 : index
    %c0_12 = arith.constant 0 : index
    %15 = vector.load %arg6[%c0_11, %c0_12] : memref<128x16xbf16, #tpu.memory_space<vmem>>, vector<128x16xbf16>
    %cst_13 = arith.constant dense<0.000000e+00> : vector<8x16xf32>
    %16 = tpu.matmul %14, %15, %cst_13 {dimension_numbers = #tpu.dot_dimension_numbers<[1], [0], [0], [1], [0, 0, 1, 1], [], []>} : vector<8x128xbf16>, vector<128x16xbf16>, vector<8x16xf32> -> vector<8x16xf32>
    %c0_14 = arith.constant 0 : index
    %c0_15 = arith.constant 0 : index
    %17 = vector.load %arg7[%c0_14, %c0_15] : memref<1x16xf32, #tpu.memory_space<vmem>>, vector<1x16xf32>
    %18 = vector.broadcast %17 : vector<1x16xf32> to vector<8x16xf32>
    %19 = arith.addf %16, %18 : vector<8x16xf32>
    %c0_16 = arith.constant 0 : index
    %c0_17 = arith.constant 0 : index
    %20 = vector.load %arg8[%c0_16, %c0_17] : memref<8x16xf32, #tpu.memory_space<vmem>>, vector<8x16xf32>
    tpu.vector_store %arg8[%c0_16, %c0_17], %19 {strides = array<i32>} : memref<8x16xf32, #tpu.memory_space<vmem>>, vector<8x16xf32>,
    return
  }
  func.func @transform_0(%arg0: i32) -> (i32, i32) {
    %c0_i32 = arith.constant 0 : i32
    %c0_i32_0 = arith.constant 0 : i32
    return %arg0, %c0_i32 : i32, i32
  }
  func.func @transform_1(%arg0: i32) -> (i32, i32) {
    %c0_i32 = arith.constant 0 : i32
    %c0_i32_0 = arith.constant 0 : i32
    return %arg0, %c0_i32 : i32, i32
  }
  func.func @transform_2(%arg0: i32) -> (i32, i32) {
    %c0_i32 = arith.constant 0 : i32
    %c0_i32_0 = arith.constant 0 : i32
    %c0_i32_1 = arith.constant 0 : i32
    return %c0_i32, %c0_i32_0 : i32, i32
  }
  func.func @transform_3(%arg0: i32) -> (i32, i32) {
    %c0_i32 = arith.constant 0 : i32
    %c0_i32_0 = arith.constant 0 : i32
    %c0_i32_1 = arith.constant 0 : i32
    return %c0_i32, %c0_i32_0 : i32, i32
  }
  func.func @transform_4(%arg0: i32) -> (i32, i32) {
    %c0_i32 = arith.constant 0 : i32
    %c0_i32_0 = arith.constant 0 : i32
    %c0_i32_1 = arith.constant 0 : i32
    return %c0_i32, %c0_i32_0 : i32, i32
  }
  func.func @transform_5(%arg0: i32) -> (i32, i32) {
    %c0_i32 = arith.constant 0 : i32
    %c0_i32_0 = arith.constant 0 : i32
    %c0_i32_1 = arith.constant 0 : i32
    return %c0_i32, %c0_i32_0 : i32, i32
  }
  func.func @transform_6(%arg0: i32) -> (i32, i32) {
    %c0_i32 = arith.constant 0 : i32
    %c0_i32_0 = arith.constant 0 : i32
    %c0_i32_1 = arith.constant 0 : i32
    return %c0_i32, %c0_i32_0 : i32, i32
  }
  func.func @transform_7(%arg0: i32) -> (i32, i32) {
    %c0_i32 = arith.constant 0 : i32
    %c0_i32_0 = arith.constant 0 : i32
    return %arg0, %c0_i32 : i32, i32
  }
}

</mosaic_0001>

<bundles_post_ra>
// kernel: tpu_custom_call.1
= control target key start
LH: loop header
LB: loop body
LE: loop exit
PB: predicated region body
PF: predicated region fallthrough
CT: control target
= control target key end

     0   :  { %s386_s0 = inlined_call_operand.vmem [shape: f32[8,32], index: 0, kind: input, shape index: {}]   ;;  %s387_s1 = inlined_call_operand.vmem [shape: f32[8,32], index: 1, kind: input, shape index: {}]   ;;  %s388_s2 = inlined_call_operand.vmem [shape: bf16[32,128], index: 2, kind: input, shape index: {}]   ;;  %s389_s3 = inlined_call_operand.vmem [shape: bf16[32,128], index: 3, kind: input, shape index: {}]   ;;  %s390_s4 = inlined_call_operand.vmem [shape: f32[1,128], index: 4, kind: input, shape index: {}]   ;;  %s391_s5 = inlined_call_operand.vmem [shape: bf16[128,16], index: 5, kind: input, shape index: {}]   ;;  %s392_s6 = inlined_call_operand.vmem [shape: f32[1,16], index: 6, kind: input, shape index: {}]   ;;  %s393_s7 = inlined_call_operand.hbm [shape: f32[8,16], index: 7, kind: output, shape index: {}]  }
   0x1   :  { %v256_v0 = vld [vmem:[%s389_s3 + $0x8] sm:$0xff]  ;;  %v255_v2 = vld [vmem:[%s389_s3] sm:$0xff]  ;;  %v264_v6 = vld [vmem:[%s391_s5 + $0x38] sm:$0xff] }
   0x2   :  { %v254_v1 = vld [vmem:[%s388_s2 + $0x8] sm:$0xff]  ;;  %v253_v3 = vld [vmem:[%s388_s2] sm:$0xff]  ;;  %62 = vmatpush.bf16.msra.mxu0 %v256_v0  ;;  %v263_v7 = vld [vmem:[%s391_s5 + $0x30] sm:$0xff]  ;;  %172 = vmatpush.bf16.msra.mxu2 %v264_v6 }
   0x3   :  { %90 = vmatpush.bf16.msra.mxu1 %v254_v1  ;;  %v34_v4 = vld [vmem:[%s387_s1] sm:$0xff] }
   0x4   :  { %v28_v5 = vld [vmem:[%s386_s0] sm:$0xff] }
   0x5   :  { %12 = vsyncpa [#allocation3], 0  ;;  %v35_v8 = vpack.c.bf16 %v34_v4, %v34_v4  ;;  %v29_v9 = vpack.c.bf16 %v28_v5, %v28_v5  ;;  %vm52_vm0 = vcmask 261120   ;;  %v262_v10 = vld [vmem:[%s391_s5 + $0x28] sm:$0xff]  ;;  %v261_v11 = vld [vmem:[%s391_s5 + $0x20] sm:$0xff]  ;;  %s294_s29 = smov [#allocation2]  }
   0x6   :  { %63 = vmatpush.bf16.msra.mxu0 %v255_v2  ;;  %173 = vmatpush.bf16.msra.mxu2 %v263_v7  ;;  %v260_v12 = vld [vmem:[%s391_s5 + $0x18] sm:$0xff]  ;;  %v259_v13 = vld [vmem:[%s391_s5 + $0x10] sm:$0xff]  ;;  %v258_v14 = vld [vmem:[%s391_s5 + $0x8] sm:$0xff]  ;;  %s194_s9 = sshll.u32 %s393_s7, 4  ;;  %vm185_vm1 = vcmask 130048   ;;  %s195_s9 = int_to_ptr.hbm [resolvable:$true] %s194_s9 }
   0x7   :  { %91 = vmatpush.bf16.msra.mxu1 %v253_v3  ;;  %v257_v15 = vld [vmem:[%s391_s5] sm:$0xff]  ;;  %s192_s5 = sshll.u32 %s294_s29, 4  ;;  %s193_s5 = int_to_ptr.vmem [resolvable:$true] %s192_s5 }
   0x8   :  { %v266_v16 = vld [vmem:[%s390_s4] ss:$0 sm:$0xff] }
   0x9   :  { %211 = vmatmul.msk.bf16.vlgmr.msra.gmra.mxu0 %vm52_vm0, %v35_v8  ;;  %v267_v25 = vld [vmem:[%s392_s6] ss:$0 sm:$0xff] }
   0xa   :  { %220 = vmatmul.msk.bf16.vlgmr.msra.gmra.mxu1 %vm52_vm0, %v29_v9  ;;  %174 = vmatpush.bf16.msra.mxu2 %v262_v10 }
   0xe   :  { %175 = vmatpush.bf16.msra.mxu2 %v261_v11 }
  0x12   :  { %176 = vmatpush.bf16.msra.mxu2 %v260_v12 }
  0x16   :  { %177 = vmatpush.bf16.msra.mxu2 %v259_v13 }
  0x1a   :  { %178 = vmatpush.bf16.msra.mxu2 %v258_v14 }
  0x1e   :  { %179 = vmatpush.bf16.msra.mxu2 %v257_v15 }
  0x86   :  { %v65_v17 = vpop.f32.mrf.mxu0 }
  0x87   :  { %v93_v18 = vpop.f32.mrf.mxu1 }
  0x88   :  { %v94_v19 = vadd.f32 %v93_v18, %v65_v17 }
  0x8a   :  { %v101_v20 = vadd.f32 %v266_v16, %v94_v19 }
  0x8c   :  { %v102_v21 = vmax.f32 %v101_v20, 0.0 }
  0x8e   :  { %v103_v22 = vpack.c.bf16 %v102_v21, %v102_v21  ;;  %v67_v23 = vpop.f32.mrf.mxu0 }
  0x8f   :  { %v95_v24 = vpop.f32.mrf.mxu1 }
  0x90   :  { %180 = vmatmul.bf16.vlgmr.msra.gmra.mxu2 %v103_v22 }
 0x113   :  { %v181_v26 = vpop.f32.mrf.mxu2 }
 0x114   :  { %v182_v27 = vadd.f32 %v267_v25, %v181_v26 }
 0x116   :  { %186 = vst.msk [vmem:[#allocation2] sm:$0xff] %vm185_vm1, %v182_v27 }
 0x117   :  { %197 = dma.vmem_to_hbm [thread:$0]  %s193_s5, 128, %s195_s9, [#allocation3]  }
 0x11b   :  { %v183_v28 = vpop.f32.mrf.mxu2 }
 0x11c   :  { %292 = dma.done.wait [#allocation3], 128  }
 0x11d   :  { %293 = vsyncadd [#allocation3], 4294967168 }
 0x11e   :  { %202 = vsyncpa [#allocation3], 1 }

// kernel: tpu_custom_call.1
= control target key start
LH: loop header
LB: loop body
LE: loop exit
PB: predicated region body
PF: predicated region fallthrough
CT: control target
= control target key end

     0   :  { %s386_s0 = inlined_call_operand.vmem [shape: f32[8,32], index: 0, kind: input, shape index: {}]   ;;  %s387_s1 = inlined_call_operand.vmem [shape: f32[8,32], index: 1, kind: input, shape index: {}]   ;;  %s388_s2 = inlined_call_operand.vmem [shape: bf16[32,128], index: 2, kind: input, shape index: {}]   ;;  %s389_s3 = inlined_call_operand.vmem [shape: bf16[32,128], index: 3, kind: input, shape index: {}]   ;;  %s390_s4 = inlined_call_operand.vmem [shape: f32[1,128], index: 4, kind: input, shape index: {}]   ;;  %s391_s5 = inlined_call_operand.vmem [shape: bf16[128,16], index: 5, kind: input, shape index: {}]   ;;  %s392_s6 = inlined_call_operand.vmem [shape: f32[1,16], index: 6, kind: input, shape index: {}]   ;;  %s393_s7 = inlined_call_operand.hbm [shape: f32[8,16], index: 7, kind: output, shape index: {}]  }
   0x1   :  { %v256_v0 = vld [vmem:[%s389_s3 + $0x8] sm:$0xff]  ;;  %v255_v2 = vld [vmem:[%s389_s3] sm:$0xff]  ;;  %v264_v6 = vld [vmem:[%s391_s5 + $0x38] sm:$0xff] }
   0x2   :  { %v254_v1 = vld [vmem:[%s388_s2 + $0x8] sm:$0xff]  ;;  %v253_v3 = vld [vmem:[%s388_s2] sm:$0xff]  ;;  %62 = vmatpush.bf16.msra.mxu0 %v256_v0  ;;  %v263_v7 = vld [vmem:[%s391_s5 + $0x30] sm:$0xff]  ;;  %172 = vmatpush.bf16.msra.mxu2 %v264_v6 }
   0x3   :  { %90 = vmatpush.bf16.msra.mxu1 %v254_v1  ;;  %v34_v4 = vld [vmem:[%s387_s1] sm:$0xff] }
   0x4   :  { %v28_v5 = vld [vmem:[%s386_s0] sm:$0xff] }
   0x5   :  { %12 = vsyncpa [#allocation3], 0  ;;  %v35_v8 = vpack.c.bf16 %v34_v4, %v34_v4  ;;  %v29_v9 = vpack.c.bf16 %v28_v5, %v28_v5  ;;  %vm52_vm0 = vcmask 261120   ;;  %v262_v10 = vld [vmem:[%s391_s5 + $0x28] sm:$0xff]  ;;  %v261_v11 = vld [vmem:[%s391_s5 + $0x20] sm:$0xff]  ;;  %s294_s29 = smov [#allocation2]  }
   0x6   :  { %63 = vmatpush.bf16.msra.mxu0 %v255_v2  ;;  %173 = vmatpush.bf16.msra.mxu2 %v263_v7  ;;  %v260_v12 = vld [vmem:[%s391_s5 + $0x18] sm:$0xff]  ;;  %v259_v13 = vld [vmem:[%s391_s5 + $0x10] sm:$0xff]  ;;  %v258_v14 = vld [vmem:[%s391_s5 + $0x8] sm:$0xff]  ;;  %s194_s9 = sshll.u32 %s393_s7, 4  ;;  %vm185_vm1 = vcmask 130048   ;;  %s195_s9 = int_to_ptr.hbm [resolvable:$true] %s194_s9 }
   0x7   :  { %91 = vmatpush.bf16.msra.mxu1 %v253_v3  ;;  %v257_v15 = vld [vmem:[%s391_s5] sm:$0xff]  ;;  %s192_s5 = sshll.u32 %s294_s29, 4  ;;  %s193_s5 = int_to_ptr.vmem [resolvable:$true] %s192_s5 }
   0x8   :  { %v266_v16 = vld [vmem:[%s390_s4] ss:$0 sm:$0xff] }
   0x9   :  { %211 = vmatmul.msk.bf16.vlgmr.msra.gmra.mxu0 %vm52_vm0, %v35_v8  ;;  %v267_v25 = vld [vmem:[%s392_s6] ss:$0 sm:$0xff] }
   0xa   :  { %220 = vmatmul.msk.bf16.vlgmr.msra.gmra.mxu1 %vm52_vm0, %v29_v9  ;;  %174 = vmatpush.bf16.msra.mxu2 %v262_v10 }
   0xe   :  { %175 = vmatpush.bf16.msra.mxu2 %v261_v11 }
  0x12   :  { %176 = vmatpush.bf16.msra.mxu2 %v260_v12 }
  0x16   :  { %177 = vmatpush.bf16.msra.mxu2 %v259_v13 }
  0x1a   :  { %178 = vmatpush.bf16.msra.mxu2 %v258_v14 }
  0x1e   :  { %179 = vmatpush.bf16.msra.mxu2 %v257_v15 }
  0x86   :  { %v65_v17 = vpop.f32.mrf.mxu0 }
  0x87   :  { %v93_v18 = vpop.f32.mrf.mxu1 }
  0x88   :  { %v94_v19 = vadd.f32 %v93_v18, %v65_v17 }
  0x8a   :  { %v101_v20 = vadd.f32 %v266_v16, %v94_v19 }
  0x8c   :  { %v102_v21 = vmax.f32 %v101_v20, 0.0 }
  0x8e   :  { %v103_v22 = vpack.c.bf16 %v102_v21, %v102_v21  ;;  %v67_v23 = vpop.f32.mrf.mxu0 }
  0x8f   :  { %v95_v24 = vpop.f32.mrf.mxu1 }
  0x90   :  { %180 = vmatmul.bf16.vlgmr.msra.gmra.mxu2 %v103_v22 }
 0x113   :  { %v181_v26 = vpop.f32.mrf.mxu2 }
 0x114   :  { %v182_v27 = vadd.f32 %v267_v25, %v181_v26 }
 0x116   :  { %186 = vst.msk [vmem:[#allocation2] sm:$0xff] %vm185_vm1, %v182_v27 }
 0x117   :  { %197 = dma.vmem_to_hbm [thread:$0]  %s193_s5, 128, %s195_s9, [#allocation3]  }
 0x11b   :  { %v183_v28 = vpop.f32.mrf.mxu2 }
 0x11c   :  { %292 = dma.done.wait [#allocation3], 128  }
 0x11d   :  { %293 = vsyncadd [#allocation3], 4294967168 }
 0x11e   :  { %202 = vsyncpa [#allocation3], 1 }

</bundles_post_ra>
